<compile_context>
chip_gen: v5e
topology: v5e:2x2
jax: 0.10.0
libtpu: 0.0.40
codegen_flags: <defaults>
</compile_context>

<pallas_src>
import jax
import jax.numpy as jnp
from jax.experimental import pallas as pl
from jax.experimental.pallas import tpu as pltpu

_LANES = 128
_TARGET_BLOCK_BYTES = 8 * 1024 * 1024   # ~8 MiB blocks (v6e/v7x sweet spot; fine on v5e)
_VMEM_LIMIT_BYTES = 48 * 1024 * 1024    # 2 in + 2 out 8 MiB buffers + headroom
_MIN_SPLIT_BYTES = 256 * 1024           # only split the grid if each step >= ~256 KiB


def _round_up(a, m):
    return (a + m - 1) // m * m


def _clamp_kernel(x_ref, o_ref):
    # Elementwise clamp on the whole VMEM tile (2 VPU ops per vreg).
    x = x_ref[...]
    lo = jnp.asarray(0, dtype=x.dtype)
    hi = jnp.asarray(10, dtype=x.dtype)
    o_ref[...] = jnp.minimum(jnp.maximum(x, lo), hi)


def _choose_tiling(rows, itemsize):
    """Pick (row_tile, grid_steps) for a (rows, 128) slab. Ragged last block OK."""
    # Sublane packing: f32 -> 8-row vregs, bf16 -> 16, int8/fp8 -> 32.
    row_align = 8 * max(1, 4 // itemsize)

    # Largest aligned row-tile that stays at ~8 MiB per block.
    row_tile_cap = max(
        row_align,
        (_TARGET_BLOCK_BYTES // (_LANES * itemsize)) // row_align * row_align,
    )
    min_split_rows = max(row_align, _MIN_SPLIT_BYTES // (_LANES * itemsize))

    g = pl.cdiv(rows, row_tile_cap)
    if g == 1:
        if rows < 2 * min_split_rows:
            # Small input: one (possibly ragged) block; splitting would just
            # add ~0.35 us serial step overhead on v5e/v6e.
            return min(row_tile_cap, _round_up(rows, row_align)), 1
        g = 2  # enough work for both v7x TensorCores

    # v7x megacore load balance: keep the step count even (harmless extra
    # small step on the single-TC v5e/v6e generations).
    if g % 2 == 1:
        g += 1

    row_tile = min(row_tile_cap, _round_up(pl.cdiv(rows, g), row_align))
    grid_steps = pl.cdiv(rows, row_tile)
    return row_tile, grid_steps


def net_clamp_forward(x, donate_input=False):
    """Clamp every element of `x` to [0, 10], like torch.clamp(x, 0, 10)."""
    orig_shape = x.shape
    dtype = x.dtype
    n = x.size
    if n == 0:
        return x
    itemsize = jnp.dtype(dtype).itemsize

    if n % _LANES != 0:
        # TODO(synk): could handle the <128-element tail with an in-kernel
        # masked store; a single-pass jnp.clip already hits the one-read +
        # one-write roofline for these shapes, so no pad/slice round trip.
        return jnp.clip(x, jnp.asarray(0, dtype), jnp.asarray(10, dtype))

    rows = n // _LANES
    row_tile, grid_steps = _choose_tiling(rows, itemsize)

    # Flatten to a lane-dense (rows, 128) slab — free for contiguous inputs,
    # no padding needed since n % 128 == 0 and ragged row-blocks are masked.
    x2d = x.reshape(rows, _LANES)

    extra = {}
    if donate_input:
        # Valid now that in/out shapes match exactly (no pad path); lets XLA
        # reuse the input buffer when the caller donates x.
        extra["input_output_aliases"] = {0: 0}

    out2d = pl.pallas_call(
        _clamp_kernel,
        out_shape=jax.ShapeDtypeStruct((rows, _LANES), dtype),
        grid_spec=pltpu.PrefetchScalarGridSpec(
            num_scalar_prefetch=0,
            grid=(grid_steps,),
            in_specs=[pl.BlockSpec((row_tile, _LANES), lambda i: (i, 0))],
            out_specs=pl.BlockSpec((row_tile, _LANES), lambda i: (i, 0)),
        ),
        compiler_params=pltpu.CompilerParams(
            dimension_semantics=("parallel",),
            vmem_limit_bytes=_VMEM_LIMIT_BYTES,
        ),
        cost_estimate=pl.CostEstimate(
            flops=2 * n,
            transcendentals=0,
            bytes_accessed=2 * n * itemsize,
        ),
        **extra,
    )(x2d)

    return out2d.reshape(orig_shape)


if __name__ == "__main__":
    key = jax.random.PRNGKey(0)

    # Small NCHW input consistent with the module's forward (any shape works).
    x = jax.random.normal(key, (2, 4, 16, 16), dtype=jnp.float32) * 8.0
    y = net_clamp_forward(x)
    jax.block_until_ready(y)
    y_ref = jnp.clip(x, 0.0, 10.0)
    assert y.shape == x.shape and y.dtype == x.dtype
    assert jnp.allclose(y, y_ref), "clamp mismatch vs reference"

    # Ragged single block (rows=3, block rows=8) exercises Pallas boundary masking.
    x2 = jax.random.normal(jax.random.PRNGKey(1), (3, 128), dtype=jnp.float32) * 20.0
    y2 = net_clamp_forward(x2)
    jax.block_until_ready(y2)
    assert jnp.allclose(y2, jnp.clip(x2, 0.0, 10.0)), "ragged-block clamp mismatch"

    # Non-128-multiple element count takes the single-pass jnp.clip fallback.
    x3 = jax.random.normal(jax.random.PRNGKey(2), (3, 5, 7), dtype=jnp.float32) * 20.0
    y3 = net_clamp_forward(x3)
    jax.block_until_ready(y3)
    assert jnp.allclose(y3, jnp.clip(x3, 0.0, 10.0)), "fallback clamp mismatch"

    print("KERNEL_OK")
</pallas_src>

<mosaic_0001>
module attributes {stable_mosaic.version = 11 : i64} {
  func.func @_clamp_kernel(%arg0: i32, %arg1: memref<16x128xf32, #tpu.memory_space<vmem>>, %arg2: memref<16x128xf32, #tpu.memory_space<vmem>>) attributes {dimension_semantics = [#tpu.dimension_semantics<parallel>], iteration_bounds = array<i64: 1>, scalar_prefetch = 0 : i64, scratch_operands = 0 : i64, tpu.core_type = #tpu.core_type<tc>, window_params = [{transform_indices = @transform_0, window_bounds = array<i64: 16, 128>}, {transform_indices = @transform_1, window_bounds = array<i64: 16, 128>}]} {
    %c0 = arith.constant 0 : index
    %c0_0 = arith.constant 0 : index
    %0 = vector.load %arg1[%c0, %c0_0] : memref<16x128xf32, #tpu.memory_space<vmem>>, vector<16x128xf32>
    %cst = arith.constant 0.000000e+00 : f32
    %1 = vector.broadcast %cst : f32 to vector<16x128xf32>
    %2 = arith.maximumf %0, %1 : vector<16x128xf32>
    %cst_1 = arith.constant 1.000000e+01 : f32
    %3 = vector.broadcast %cst_1 : f32 to vector<16x128xf32>
    %4 = arith.minimumf %2, %3 : vector<16x128xf32>
    %c0_2 = arith.constant 0 : index
    %c0_3 = arith.constant 0 : index
    %5 = vector.load %arg2[%c0_2, %c0_3] : memref<16x128xf32, #tpu.memory_space<vmem>>, vector<16x128xf32>
    tpu.vector_store %arg2[%c0_2, %c0_3], %4 {strides = array<i32>} : memref<16x128xf32, #tpu.memory_space<vmem>>, vector<16x128xf32>,
    return
  }
  func.func @transform_0(%arg0: i32) -> (i32, i32) {
    %c0_i32 = arith.constant 0 : i32
    %c0_i32_0 = arith.constant 0 : i32
    return %arg0, %c0_i32 : i32, i32
  }
  func.func @transform_1(%arg0: i32) -> (i32, i32) {
    %c0_i32 = arith.constant 0 : i32
    %c0_i32_0 = arith.constant 0 : i32
    return %arg0, %c0_i32 : i32, i32
  }
}

</mosaic_0001>

<bundles_post_ra>
// kernel: tpu_custom_call.1
= control target key start
LH: loop header
LB: loop body
LE: loop exit
PB: predicated region body
PF: predicated region fallthrough
CT: control target
= control target key end

     0   :  { %6 = vsyncpa [#allocation3], 0  ;;  %s128_s0 = inlined_call_operand.hbm [shape: f32[16,128], index: 0, kind: input, shape index: {}]   ;;  %s129_s1 = inlined_call_operand.hbm [shape: f32[16,128], index: 1, kind: output, shape index: {}]  }
   0x1   :  { %7 = vsyncpa [#allocation4], 0  ;;  %s12_s8 = sshll.u32 %s128_s0, 4  ;;  %s108_s9 = smov [#allocation2]   ;;  %s13_s8 = int_to_ptr.hbm [resolvable:$true] %s12_s8 }
   0x2   :  { %s14_s10 = sshll.u32 %s108_s9, 4  ;;  %s109_s11 = smov 128   ;;  %s15_s10 = int_to_ptr.vmem [resolvable:$true] %s14_s10 }
   0x3   :  { %s110_s12 = smov 8  }
   0x4   :  { %20 = dma.hbm_to_vmem [thread:$0]  %s13_s8, 256, %s15_s10, [#allocation3], %s109_s11, %s109_s11, %s110_s12  }
   0x5   :  { %104 = dma.done.wait [#allocation3], 256  }
   0x6   :  { %105 = vsyncadd [#allocation3], 4294967040  ;;  %v25_v0 = vld [vmem:[#allocation2] sm:$0xff]  ;;  %v26_v1 = vld [vmem:[#allocation2 + $0x8] sm:$0xff]  ;;  %s111_s13 = smov [#allocation5]   ;;  %s39_s17 = sshll.u32 %s129_s1, 4  ;;  %s40_s17 = int_to_ptr.hbm [resolvable:$true] %s39_s17 }
   0x7   :  { %v27_v2 = vmax.f32 %v25_v0, 0.0  ;;  %v28_v3 = vmax.f32 %v26_v1, 0.0  ;;  %s37_s14 = sshll.u32 %s111_s13, 4  ;;  %s38_s14 = int_to_ptr.vmem [resolvable:$true] %s37_s14 }
   0x9   :  { %v29_v4 = vmin.f32 %v27_v2, 10.0  ;;  %v30_v5 = vmin.f32 %v28_v3, 10.0 }
   0xb   :  { %31 = vst [vmem:[#allocation5] sm:$0xff] %v29_v4 }
   0xc   :  { %32 = vst [vmem:[#allocation5 + $0x8] sm:$0xff] %v30_v5 }
   0xd   :  { %45 = dma.vmem_to_hbm [thread:$0]  %s38_s14, 256, %s40_s17, [#allocation4], %s109_s11, %s109_s11, %s110_s12  }
   0xe   :  { %106 = dma.done.wait [#allocation4], 256  }
   0xf   :  { %107 = vsyncadd [#allocation4], 4294967040 }
  0x10   :  { %50 = vsyncpa [#allocation3], 1 }
  0x11   :  { %51 = vsyncpa [#allocation4], 1 }

</bundles_post_ra>
